<compile_context>
chip_gen: v5e
topology: v5e:2x2
jax: 0.10.0
libtpu: 0.0.40
codegen_flags: <defaults>
</compile_context>

<pallas_src>
import jax
import jax.numpy as jnp
import numpy as np
from jax.experimental import pallas as pl
from jax.experimental.pallas import tpu as pltpu


# ----------------------------------------------------------------------------
# Kernels
# ----------------------------------------------------------------------------
def gcn_layer1_kernel(a_ref, x_ref, w1_ref, b1_ref, h1_ref):
    """h1[tile] = relu((A[tile, :] @ X) @ W1 + b1)   (row-local ordering)."""
    ax = jnp.dot(a_ref[...], x_ref[...],
                 preferred_element_type=jnp.float32)            # [tm, Fp] f32
    h = jnp.dot(ax.astype(jnp.bfloat16), w1_ref[...],
                preferred_element_type=jnp.float32) + b1_ref[...]
    h1_ref[...] = jnp.maximum(h, 0.0).astype(h1_ref.dtype)      # bf16 out


def gcn_layer2_kernel(a_ref, h1_ref, w2_ref, b2_ref, wc_ref, bc_ref,
                      emb_ref, logits_ref):
    """h2[tile] = relu((A[tile, :] @ H1) @ W2 + b2);  logits = h2 @ Wc + bc."""
    agg = jnp.dot(a_ref[...], h1_ref[...],
                  preferred_element_type=jnp.float32)           # [tm, Hp] f32
    h2 = jnp.dot(agg.astype(jnp.bfloat16), w2_ref[...],
                 preferred_element_type=jnp.float32) + b2_ref[...]
    h2 = jnp.maximum(h2, 0.0)                                   # f32 embeddings
    emb_ref[...] = h2
    logits_ref[...] = (jnp.dot(h2.astype(jnp.bfloat16), wc_ref[...],
                               preferred_element_type=jnp.float32)
                       + bc_ref[...])                           # lane-dense [tm, 128]


# ----------------------------------------------------------------------------
# Sizing helpers
# ----------------------------------------------------------------------------
def _round_up(v, m):
    return ((v + m - 1) // m) * m


def _vmem_capacity():
    try:
        return int(pltpu.get_tpu_info().vmem_capacity_bytes)
    except Exception:
        return 64 << 20  # conservative default (v7x has 64 MiB per TC)


def _choose_row_tile(n, lane=256):
    """Largest row tile (multiple of 256) whose double-buffered bf16 A row
    block fits in ~35% of VMEM.  256-multiples match the v6e/v7x 256x256 MXU
    and are also 128-multiples for v5e."""
    cap = _vmem_capacity()
    budget = int(0.35 * cap)
    n_pad = _round_up(max(n, 1), lane)
    tm = lane
    while (tm + lane) <= n_pad and 2 * (tm + lane) * n_pad * 2 <= budget:
        tm += lane
    return tm


def _vmem_limit_bytes(needed):
    cap = _vmem_capacity()
    return int(min(max(2 * needed, 32 << 20), 0.75 * cap))


# ----------------------------------------------------------------------------
# Wrapper
# ----------------------------------------------------------------------------
def gcn_forward(a_norm, x, w1, b1, w2, b2, wc, bc, *, row_tile=None):
    """Returns (logits [N, C], embeddings [N, H]) matching the PyTorch module."""
    n, f = x.shape
    h = w1.shape[1]
    c = wc.shape[1]

    fp = _round_up(max(f, 1), 8)      # sublane multiple
    hp = _round_up(h, 128)            # lane multiple
    cp = _round_up(c, 128)            # lane-dense classifier output

    tm = row_tile if row_tile is not None else _choose_row_tile(n)
    n_pad = _round_up(n, tm)
    grid = (n_pad // tm,)

    def pad2(arr, shape, dtype):
        out = jnp.zeros(shape, dtype)
        return out.at[:arr.shape[0], :arr.shape[1]].set(arr.astype(dtype))

    a_p = pad2(a_norm, (n_pad, n_pad), jnp.bfloat16)
    x_p = pad2(x, (n_pad, fp), jnp.bfloat16)
    w1_p = pad2(w1, (fp, hp), jnp.bfloat16)
    w2_p = pad2(w2, (hp, hp), jnp.bfloat16)
    wc_p = pad2(wc, (hp, cp), jnp.bfloat16)
    b1_p = pad2(b1, (1, hp), jnp.float32)
    b2_p = pad2(b2, (1, hp), jnp.float32)
    bc_p = pad2(bc, (1, cp), jnp.float32)

    row_block = lambda width: pl.BlockSpec((tm, width), lambda i: (i, 0))
    resident = lambda shape: pl.BlockSpec(shape, lambda i: (0, 0))

    # VMEM estimate: double-buffered A row block + resident operands + outputs.
    a_dbuf = 2 * tm * n_pad * 2
    need1 = a_dbuf + (n_pad * fp + fp * hp) * 2 + hp * 4 + 2 * tm * hp * 2
    need2 = a_dbuf + (n_pad * hp + hp * hp + hp * cp) * 2 + (hp + cp) * 4 \
        + 2 * tm * (hp + cp) * 4
    cparams = pltpu.CompilerParams(
        dimension_semantics=("parallel",),
        vmem_limit_bytes=_vmem_limit_bytes(max(need1, need2)))

    ce1 = pl.CostEstimate(
        flops=2 * (n_pad * n_pad * fp + n_pad * fp * hp),
        transcendentals=0,
        bytes_accessed=2 * (n_pad * n_pad + n_pad * fp + fp * hp + n_pad * hp)
        + 4 * hp)
    ce2 = pl.CostEstimate(
        flops=2 * (n_pad * n_pad * hp + n_pad * hp * hp + n_pad * hp * cp),
        transcendentals=0,
        bytes_accessed=2 * (n_pad * n_pad + n_pad * hp + hp * hp + hp * cp)
        + 4 * (hp + cp + n_pad * hp + n_pad * cp))

    # Pass 1: conv1  (A streamed row-tiled, X/W1/b1 resident).
    h1 = pl.pallas_call(
        gcn_layer1_kernel,
        grid=grid,
        in_specs=[row_block(n_pad),          # A row block (streamed)
                  resident((n_pad, fp)),     # X (full, resident)
                  resident((fp, hp)),        # W1
                  resident((1, hp))],        # b1
        out_specs=row_block(hp),
        out_shape=jax.ShapeDtypeStruct((n_pad, hp), jnp.bfloat16),
        compiler_params=cparams,
        cost_estimate=ce1,
    )(a_p, x_p, w1_p, b1_p)

    # Pass 2: conv2 + classifier (A streamed row-tiled, H1/W2/Wc/biases resident).
    emb, logits = pl.pallas_call(
        gcn_layer2_kernel,
        grid=grid,
        in_specs=[row_block(n_pad),          # A row block (streamed)
                  resident((n_pad, hp)),     # H1 (full, resident)
                  resident((hp, hp)),        # W2
                  resident((1, hp)),         # b2
                  resident((hp, cp)),        # Wc (lane-padded)
                  resident((1, cp))],        # bc
        out_specs=(row_block(hp), row_block(cp)),
        out_shape=(jax.ShapeDtypeStruct((n_pad, hp), jnp.float32),   # embeddings
                   jax.ShapeDtypeStruct((n_pad, cp), jnp.float32)),  # logits (padded)
        compiler_params=cparams,
        cost_estimate=ce2,
    )(a_p, h1, w2_p, b2_p, wc_p, bc_p)

    return logits[:n, :c], emb[:n, :h]


def build_normalized_adjacency(edge_index, num_nodes):
    """Dense D^-1/2 (A + I) D^-1/2, matching PyG GCNConv's gcn_norm.
    Uses an add-scatter so duplicate edges accumulate like message passing."""
    src, dst = edge_index
    a = jnp.zeros((num_nodes, num_nodes), jnp.float32).at[dst, src].add(1.0)
    a_hat = a + jnp.eye(num_nodes, dtype=jnp.float32)
    deg = a_hat.sum(axis=1)
    d_inv_sqrt = jnp.where(deg > 0, 1.0 / jnp.sqrt(deg), 0.0)
    return d_inv_sqrt[:, None] * a_hat * d_inv_sqrt[None, :]


if __name__ == "__main__":
    # Small synthetic graph consistent with the module:
    #   num_features = 4, hidden_dim = 32, num_classes = 2, 512 nodes.
    N, F, H, C = 512, 4, 32, 2

    key = jax.random.PRNGKey(0)
    kx, k1, k2, k3, k4, k5, k6 = jax.random.split(key, 7)

    x = jax.random.normal(kx, (N, F), jnp.float32)

    # Deterministic graph: bidirectional ring + 64 long-range chords.
    idx = np.arange(N)
    chord = idx[:64]
    src = np.concatenate([idx, (idx + 1) % N, chord, (chord + N // 3) % N])
    dst = np.concatenate([(idx + 1) % N, idx, (chord + N // 3) % N, chord])
    edge_index = jnp.asarray(np.stack([src, dst]), jnp.int32)

    a_norm = build_normalized_adjacency(edge_index, N)

    # Deterministic parameter init (Glorot-like scaling).
    w1 = jax.random.normal(k1, (F, H), jnp.float32) / np.sqrt(F)
    b1 = jax.random.normal(k5, (1, H), jnp.float32) * 0.1
    w2 = jax.random.normal(k2, (H, H), jnp.float32) / np.sqrt(H)
    b2 = jax.random.normal(k6, (1, H), jnp.float32) * 0.1
    wc = jax.random.normal(k3, (H, C), jnp.float32) / np.sqrt(H)
    bc = jax.random.normal(k4, (1, C), jnp.float32) * 0.01

    # row_tile=128 forces a 4-step grid so the streamed / double-buffered path
    # is exercised even at this small demo size (auto-chooser would pick 512).
    logits, embeddings = jax.block_until_ready(
        gcn_forward(a_norm, x, w1, b1, w2, b2, wc, bc, row_tile=128))

    # Pure-JAX reference mirroring the kernel's bf16-operand / f32-accumulate math.
    bf = lambda t: t.astype(jnp.bfloat16)
    mm = lambda p, q: jnp.dot(bf(p), bf(q), preferred_element_type=jnp.float32)
    h1_ref = jnp.maximum(mm(mm(a_norm, x), w1) + b1, 0.0)
    h2_ref = jnp.maximum(mm(mm(a_norm, h1_ref), w2) + b2, 0.0)
    logits_ref = mm(h2_ref, wc) + bc

    assert logits.shape == (N, C) and embeddings.shape == (N, H)
    np.testing.assert_allclose(np.asarray(logits), np.asarray(logits_ref),
                               rtol=5e-3, atol=5e-3)
    np.testing.assert_allclose(np.asarray(embeddings), np.asarray(h2_ref),
                               rtol=5e-3, atol=5e-3)

    print("KERNEL_OK")
</pallas_src>

<mosaic_0001>
module attributes {stable_mosaic.version = 11 : i64} {
  func.func @gcn_layer1_kernel(%arg0: i32, %arg1: memref<128x512xbf16, #tpu.memory_space<vmem>>, %arg2: memref<512x8xbf16, #tpu.memory_space<vmem>>, %arg3: memref<8x128xbf16, #tpu.memory_space<vmem>>, %arg4: memref<1x128xf32, #tpu.memory_space<vmem>>, %arg5: memref<128x128xbf16, #tpu.memory_space<vmem>>) attributes {dimension_semantics = [#tpu.dimension_semantics<parallel>], iteration_bounds = array<i64: 4>, scalar_prefetch = 0 : i64, scratch_operands = 0 : i64, tpu.core_type = #tpu.core_type<tc>, window_params = [{transform_indices = @transform_0, window_bounds = array<i64: 128, 512>}, {pipeline_mode = #tpu.pipeline_mode<synchronous>, transform_indices = @transform_1, window_bounds = array<i64: 512, 8>}, {pipeline_mode = #tpu.pipeline_mode<synchronous>, transform_indices = @transform_2, window_bounds = array<i64: 8, 128>}, {pipeline_mode = #tpu.pipeline_mode<synchronous>, transform_indices = @transform_3, window_bounds = array<i64: 1, 128>}, {transform_indices = @transform_4, window_bounds = array<i64: 128, 128>}]} {
    %c0 = arith.constant 0 : index
    %c0_0 = arith.constant 0 : index
    %0 = vector.load %arg1[%c0, %c0_0] : memref<128x512xbf16, #tpu.memory_space<vmem>>, vector<128x512xbf16>
    %c0_1 = arith.constant 0 : index
    %c0_2 = arith.constant 0 : index
    %1 = vector.load %arg2[%c0_1, %c0_2] : memref<512x8xbf16, #tpu.memory_space<vmem>>, vector<512x8xbf16>
    %cst = arith.constant dense<0.000000e+00> : vector<128x8xf32>
    %2 = tpu.matmul %0, %1, %cst {dimension_numbers = #tpu.dot_dimension_numbers<[1], [0], [0], [1], [0, 0, 1, 1], [], []>} : vector<128x512xbf16>, vector<512x8xbf16>, vector<128x8xf32> -> vector<128x8xf32>
    %3 = arith.truncf %2 : vector<128x8xf32> to vector<128x8xbf16>
    %c0_3 = arith.constant 0 : index
    %c0_4 = arith.constant 0 : index
    %4 = vector.load %arg3[%c0_3, %c0_4] : memref<8x128xbf16, #tpu.memory_space<vmem>>, vector<8x128xbf16>
    %cst_5 = arith.constant dense<0.000000e+00> : vector<128x128xf32>
    %5 = tpu.matmul %3, %4, %cst_5 {dimension_numbers = #tpu.dot_dimension_numbers<[1], [0], [0], [1], [0, 0, 1, 1], [], []>} : vector<128x8xbf16>, vector<8x128xbf16>, vector<128x128xf32> -> vector<128x128xf32>
    %c0_6 = arith.constant 0 : index
    %c0_7 = arith.constant 0 : index
    %6 = vector.load %arg4[%c0_6, %c0_7] : memref<1x128xf32, #tpu.memory_space<vmem>>, vector<1x128xf32>
    %7 = vector.broadcast %6 : vector<1x128xf32> to vector<128x128xf32>
    %8 = arith.addf %5, %7 : vector<128x128xf32>
    %cst_8 = arith.constant 0.000000e+00 : f32
    %9 = vector.broadcast %cst_8 : f32 to vector<128x128xf32>
    %10 = arith.maximumf %8, %9 : vector<128x128xf32>
    %11 = arith.truncf %10 : vector<128x128xf32> to vector<128x128xbf16>
    %c0_9 = arith.constant 0 : index
    %c0_10 = arith.constant 0 : index
    %12 = vector.load %arg5[%c0_9, %c0_10] : memref<128x128xbf16, #tpu.memory_space<vmem>>, vector<128x128xbf16>
    tpu.vector_store %arg5[%c0_9, %c0_10], %11 {strides = array<i32>} : memref<128x128xbf16, #tpu.memory_space<vmem>>, vector<128x128xbf16>,
    return
  }
  func.func @transform_0(%arg0: i32) -> (i32, i32) {
    %c0_i32 = arith.constant 0 : i32
    %c0_i32_0 = arith.constant 0 : i32
    return %arg0, %c0_i32 : i32, i32
  }
  func.func @transform_1(%arg0: i32) -> (i32, i32) {
    %c0_i32 = arith.constant 0 : i32
    %c0_i32_0 = arith.constant 0 : i32
    %c0_i32_1 = arith.constant 0 : i32
    return %c0_i32, %c0_i32_0 : i32, i32
  }
  func.func @transform_2(%arg0: i32) -> (i32, i32) {
    %c0_i32 = arith.constant 0 : i32
    %c0_i32_0 = arith.constant 0 : i32
    %c0_i32_1 = arith.constant 0 : i32
    return %c0_i32, %c0_i32_0 : i32, i32
  }
  func.func @transform_3(%arg0: i32) -> (i32, i32) {
    %c0_i32 = arith.constant 0 : i32
    %c0_i32_0 = arith.constant 0 : i32
    %c0_i32_1 = arith.constant 0 : i32
    return %c0_i32, %c0_i32_0 : i32, i32
  }
  func.func @transform_4(%arg0: i32) -> (i32, i32) {
    %c0_i32 = arith.constant 0 : i32
    %c0_i32_0 = arith.constant 0 : i32
    return %arg0, %c0_i32 : i32, i32
  }
}

</mosaic_0001>

<bundles_post_ra>
// kernel: tpu_custom_call.1
= control target key start
LH: loop header
LB: loop body
LE: loop exit
PB: predicated region body
PF: predicated region fallthrough
CT: control target
= control target key end

     0   :  { %9 = vsyncpa [#allocation3], 0  ;;  %s2047_s0 = inlined_call_operand.hbm [shape: bf16[512,512], index: 0, kind: input, shape index: {}]   ;;  %s2048_s1 = inlined_call_operand.vmem [shape: bf16[512,8], index: 1, kind: input, shape index: {}]   ;;  %s2049_s2 = inlined_call_operand.vmem [shape: bf16[8,128], index: 2, kind: input, shape index: {}]   ;;  %s2050_s3 = inlined_call_operand.vmem [shape: f32[1,128], index: 3, kind: input, shape index: {}]   ;;  %s2051_s4 = inlined_call_operand.hbm [shape: bf16[512,128], index: 4, kind: output, shape index: {}]  }
   0x1   :  { %11 = vsyncpa [#allocation3 + $0x1], 0 }
   0x2   :  { %12 = vsyncpa [#allocation4], 0 }
   0x3   :  { %14 = vsyncpa [#allocation4 + $0x1], 0  ;;  %s1689_s15 = smov 0   ;;  %s1691_s16 = smov 0  }
   0x4   :  { %s1693_s17 = smov 0   ;;  %s1695_s18 = smov 0  }
   0x5 LB: > { %s1710_s19 = sadd.s32 4294967295, %s1658_s18   ;;  %s1094_s20 = sadd.s32 4294967294, %s1658_s18   ;;  %s1658_s18 = sphi %s1695_s18, %s2060_s18   ;;  %s1654_s17 = sphi %s1693_s17, %s2059_s17   ;;  %s1650_s16 = sphi %s1691_s16, %s2058_s16   ;;  %s1646_s15 = sphi %s1689_s15, %s2057_s15  }
   0x6   : > { %s1714_s21 = sadd.s32 1, %s1658_s18   ;;  %s27_s22 = sadd.s32 1, %s1654_s17 }
   0x7   : > { %s24_s23 = ssub.s32 %s1658_s18, %s1714_s21  ;;  %p34_p0 = scmp.ne.s32.totalorder %s1654_s17, %s1650_s16 }
   0x8   : > { %p25_p1 = scmp.eq.s32.totalorder %s24_s23, 0  ;;  %p35_p2 = scmp.eq.s32.totalorder %s1658_s18, 0 }
   0x9   : > { %p40_p3 = scmp.ne.s32.totalorder %s1650_s16, %s1646_s15  ;;  %p41_p4 = scmp.eq.s32.totalorder %s1710_s19, 0 }
   0xa   : > { %s1726_s24 = scalar_select %p25_p1, %s1654_s17, %s27_s22  }
   0xb   : > { %p1728_p5 = por %p35_p2, %p34_p0  ;;  %p1732_p6 = por %p41_p4, %p40_p3 }
   0xc   : > { %p127_p7 = scmp.eq.s32.totalorder %s1710_s19, 3  ;;  %p133_p8 = scmp.eq.s32.totalorder %s1094_s20, 3 }
   0xd   : > { %p1523_p9 = scmp.lt.s32.totalorder %s1658_s18, 4  ;;  %s162_s29 = sand.u32 1, %s1654_s17  }
   0xe   : > { %p1738_p10 = por %p127_p7, %p34_p0  ;;  %p1742_p11 = por %p133_p8, %p40_p3 }
   0xf   : > { %s1374_s30 = sshll.u32 %s1658_s18, 8  ;;  %s1097_s5 = sshll.u32 %s162_s29, 8 }
  0x10   : > { %s172_s8 = scalar_lea.hbm %s2047_s0, %s1374_s30  ;;  %s166_s10 = scalar_lea.vmem [#allocation2], %s1097_s5 }
  0x11   : > { %s173_s9 = sshll.u32 %s172_s8, 4  ;;  %s175_s11 = sshll.u32 %s166_s10, 4  ;;  %s174_s9 = int_to_ptr.hbm [resolvable:$true] %s173_s9  ;;  %s176_s11 = int_to_ptr.vmem [resolvable:$true] %s175_s11 }
  0x12   : > { %p1753_p12 = pnand %p1523_p9, %p1728_p5  ;;  %p1101_p13 = scmp.ge.s32.totalorder %s1658_s18, 1 }
  0x13   : > { %p183_p0 = scmp.lt.s32.totalorder %s1658_s18, 5  ;;  %s163_s13 = scalar_lea.sflag [#allocation3], %s162_s29 }
  0x14   : > { %s1562_s14 = sshra.s32 %s174_s9, 4  ;;  %p1566_p2 = pneg %p1753_p12  ;;  %s1563_s14 = int_to_ptr.hbm [resolvable:$true] %s1562_s14 }
  0x15   : > { %s1564_s20 = scalar_lea.hbm %s1563_s14, 256  ;;  %s1569_s25 = scalar_lea.hbm %s2047_s0, 1024 }
  0x16   : > { %p1565_p1 = scmp.ne.s32.totalorder %s1563_s14, %s1564_s20  ;;  %p1570_p5 = scmp.lt.s32.totalorder %s1563_s14, %s2047_s0 }
  0x17   : > { %p1571_p7 = scmp.lt.s32.totalorder %s1569_s25, %s1564_s20 }
  0x18   : > { %p1567_p3 = pnand %p1566_p2, %p1565_p1 }
  0x19   : > { %p1572_p8 = por %p1571_p7, %p1570_p5 }
  0x1a   : > { %p1568_p4 = pneg %p1567_p3 }
  0x1c   : > { %p1573_p9 = pnand %p1572_p8, %p1568_p4 }
  0x1e   : > { %1576 = shalt.err (!%p1573_p9)
}
  0x1f   : > { %s1660_s29 = smov 256   ;;  %s1661_s6 = smov 16  }
  0x20   : > { %1518 = dma.hbm_to_vmem [thread:$0]  (!%p1753_p12), %s174_s9, 4096, %s176_s11, %s163_s13, %s1660_s29, %s1660_s29, %s1661_s6  }
  0x21   : > { %p184_p1 = pnand %p1101_p13, %p183_p0 }
  0x22   : > { %s1774_s7 = sand.u32 (!%p184_p1), 1, %s1650_s16  }
  0x23   : > { %187 = sbr.rel (%p184_p1) target bundleno = 508 (0x1fc), region = 36  ;;  %s1102_s8 = sshll.u32 (!%p184_p1), %s1774_s7, 8 }
  0x24   : > { %s190_s10 = scalar_lea.sflag (!%p184_p1), [#allocation3], %s1774_s7  ;;  %s1778_s14 = scalar_lea.vmem (!%p184_p1), [#allocation2], %s1102_s8 }
  0x28   : > { %1637 = dma.done.wait (%p1732_p6), %s190_s10, 4096  }
  0x29   : > { %1639 = vsyncadd (%p1732_p6), %s190_s10, 4294963200  ;;  %v1414_v0 = vld [vmem:[%s2048_s1 + $0x38] sm:$0xff]  ;;  %v1413_v1 = vld [vmem:[%s2048_s1 + $0x30] sm:$0xff]  ;;  %vm904_vm0 = vcmask 1043456   ;;  %vm879_vm1 = vcmask 64512   ;;  %s1103_s23 = sshll.u32 %s1774_s7, 6 }
  0x2a   : > { %1487 = vmatpush.bf16.msra.mxu1 %v1414_v0  ;;  %1488 = vmatpush.bf16.msra.mxu2 %v1414_v0  ;;  %v1412_v2 = vld [vmem:[%s2048_s1 + $0x28] sm:$0xff]  ;;  %v1411_v3 = vld [vmem:[%s2048_s1 + $0x20] sm:$0xff]  ;;  %v1410_v4 = vld [vmem:[%s2048_s1 + $0x18] sm:$0xff]  ;;  %s1990_s25 = scalar_lea.vmem [#allocation5], %s1103_s23  ;;  %s1439_s30 = sshll.u32 %s1710_s19, 6 }
  0x2b   : > { %1489 = vmatpush.bf16.msra.mxu3 %v1414_v0  ;;  %670 = vmatpush.bf16.msra.mxu0 %v1414_v0  ;;  %v1409_v5 = vld [vmem:[%s2048_s1 + $0x10] sm:$0xff]  ;;  %v1408_v6 = vld [vmem:[%s2048_s1 + $0x8] sm:$0xff]  ;;  %v1407_v7 = vld [vmem:[%s2048_s1] sm:$0xff]  ;;  %s1017_s6 = scalar_lea.hbm %s2051_s4, %s1439_s30  ;;  %s1018_s8 = sshll.u32 %s1990_s25, 4  ;;  %s1019_s8 = int_to_ptr.vmem [resolvable:$true] %s1018_s8 }
  0x2c   : > { %v1138_v8 = vld [vmem:[%s1778_s14 + $0x40] sm:$0xf]  ;;  %v1385_v9 = vld [vmem:[%s1778_s14 + $0x4c] sm:$0xf0]  ;;  %v1430_v14 = vld [vmem:[%s2048_s1 + $0xb8] sm:$0xff]  ;;  %s1020_s10 = sshll.u32 %s1017_s6, 4  ;;  %s1021_s10 = int_to_ptr.hbm [resolvable:$true] %s1020_s10 }
  0x2d   : > { %v1170_v10 = vld [vmem:[%s1778_s14 + $0x80] sm:$0xf]  ;;  %v1393_v11 = vld [vmem:[%s1778_s14 + $0x8c] sm:$0xf0]  ;;  %v1422_v15 = vld [vmem:[%s2048_s1 + $0x78] sm:$0xff]  ;;  %v1139_v17 = vor.u32 %v1385_v9, %v1138_v8  ;;  %s1006_s9 = scalar_lea.sflag [#allocation4], %s1774_s7 }
  0x2e   : > { %1490 = vmatpush.bf16.msra.mxu1 %v1413_v1  ;;  %1491 = vmatpush.bf16.msra.mxu2 %v1413_v1  ;;  %v1202_v12 = vld [vmem:[%s1778_s14 + $0xc0] sm:$0xf]  ;;  %v1401_v13 = vld [vmem:[%s1778_s14 + $0xcc] sm:$0xf0]  ;;  %v1438_v16 = vld [vmem:[%s2048_s1 + $0xf8] sm:$0xff]  ;;  %v1171_v18 = vor.u32 %v1393_v11, %v1170_v10  ;;  %s1606_s19 = sshra.s32 %s1021_s10, 4  ;;  %s1607_s19 = int_to_ptr.hbm [resolvable:$true] %s1606_s19 }
  0x2f   : > { %1492 = vmatpush.bf16.msra.mxu3 %v1413_v1  ;;  %671 = vmatpush.bf16.msra.mxu0 %v1413_v1  ;;  %v1203_v19 = vor.u32 %v1401_v13, %v1202_v12  ;;  %v1106_v20 = vld [vmem:[%s1778_s14] sm:$0xf]  ;;  %v1377_v21 = vld [vmem:[%s1778_s14 + $0xc] sm:$0xf0]  ;;  %v1428_v26 = vld [vmem:[%s2048_s1 + $0xa8] sm:$0xff]  ;;  %s1608_s11 = scalar_lea.hbm %s1607_s19, 64  ;;  %p1613_p0 = scmp.lt.s32.totalorder %s1607_s19, %s2051_s4 }
  0x30   : > { %v1429_v22 = vld [vmem:[%s2048_s1 + $0xb0] sm:$0xff]  ;;  %v1107_v25 = vor.u32 %v1377_v21, %v1106_v20  ;;  %v1420_v27 = vld [vmem:[%s2048_s1 + $0x68] sm:$0xff]  ;;  %v1427_v29 = vld [vmem:[%s2048_s1 + $0xa0] sm:$0xff]  ;;  %p1609_p6 = scmp.ne.s32.totalorder %s1607_s19, %s1608_s11  ;;  %s1612_s20 = scalar_lea.hbm %s2051_s4, 256 }
  0x31   : > { %v1421_v23 = vld [vmem:[%s2048_s1 + $0x70] sm:$0xff]  ;;  %v1436_v28 = vld [vmem:[%s2048_s1 + $0xe8] sm:$0xff]  ;;  %v1419_v30 = vld [vmem:[%s2048_s1 + $0x60] sm:$0xff]  ;;  %p1614_p2 = scmp.lt.s32.totalorder %s1612_s20, %s1608_s11 }
  0x32   : > { %1493 = vmatpush.bf16.msra.mxu1 %v1412_v2  ;;  %1494 = vmatpush.bf16.msra.mxu2 %v1412_v2  ;;  %v1437_v24 = vld [vmem:[%s2048_s1 + $0xf0] sm:$0xff]  ;;  %v1435_v31 = vld [vmem:[%s2048_s1 + $0xe0] sm:$0xff]  ;;  %v1426_v38 = vld [vmem:[%s2048_s1 + $0x98] sm:$0xff]  ;;  %p1610_p12 = pnand %p1609_p6, %p1738_p10 }
  0x33   : > { %1495 = vmatpush.bf16.msra.mxu3 %v1412_v2  ;;  %672 = vmatpush.bf16.msra.mxu0 %v1412_v2  ;;  %v1154_v32 = vld [vmem:[%s1778_s14 + $0x60] sm:$0xf]  ;;  %v1389_v33 = vld [vmem:[%s1778_s14 + $0x6c] sm:$0xf0]  ;;  %v1418_v39 = vld [vmem:[%s2048_s1 + $0x58] sm:$0xff]  ;;  %p1615_p3 = por %p1614_p2, %p1613_p0 }
  0x34   : > { %v1186_v34 = vld [vmem:[%s1778_s14 + $0xa0] sm:$0xf]  ;;  %v1397_v35 = vld [vmem:[%s1778_s14 + $0xac] sm:$0xf0]  ;;  %v1434_v40 = vld [vmem:[%s2048_s1 + $0xd8] sm:$0xff]  ;;  %v1155_v41 = vor.u32 %v1389_v33, %v1154_v32  ;;  %p1611_p13 = pneg %p1610_p12 }
  0x35   : > { %v1218_v36 = vld [vmem:[%s1778_s14 + $0xe0] sm:$0xf]  ;;  %v1405_v37 = vld [vmem:[%s1778_s14 + $0xec] sm:$0xf0]  ;;  %v1187_v42 = vor.u32 %v1397_v35, %v1186_v34  ;;  %v1424_v50 = vld [vmem:[%s2048_s1 + $0x88] sm:$0xff] }
  0x36   : > { %1496 = vmatpush.bf16.msra.mxu1 %v1411_v3  ;;  %1497 = vmatpush.bf16.msra.mxu2 %v1411_v3  ;;  %v1219_v43 = vor.u32 %v1405_v37, %v1218_v36  ;;  %v1122_v44 = vld [vmem:[%s1778_s14 + $0x20] sm:$0xf]  ;;  %v1381_v45 = vld [vmem:[%s1778_s14 + $0x2c] sm:$0xf0]  ;;  %v1416_v51 = vld [vmem:[%s2048_s1 + $0x48] sm:$0xff]  ;;  %p1616_p4 = pnand %p1615_p3, %p1611_p13 }
  0x37   : > { %1498 = vmatpush.bf16.msra.mxu3 %v1411_v3  ;;  %673 = vmatpush.bf16.msra.mxu0 %v1411_v3  ;;  %v1425_v46 = vld [vmem:[%s2048_s1 + $0x90] sm:$0xff]  ;;  %v1123_v49 = vor.u32 %v1381_v45, %v1122_v44  ;;  %v1432_v52 = vld [vmem:[%s2048_s1 + $0xc8] sm:$0xff]  ;;  %v1423_v53 = vld [vmem:[%s2048_s1 + $0x80] sm:$0xff] }
  0x38   : > { %v1417_v47 = vld [vmem:[%s2048_s1 + $0x50] sm:$0xff]  ;;  %v1415_v54 = vld [vmem:[%s2048_s1 + $0x40] sm:$0xff]  ;;  %v1114_v58 = vld [vmem:[%s1778_s14 + $0x8] sm:$0xf] }
  0x39   : > { %v1433_v48 = vld [vmem:[%s2048_s1 + $0xd0] sm:$0xff]  ;;  %v1431_v55 = vld [vmem:[%s2048_s1 + $0xc0] sm:$0xff]  ;;  %v1378_v59 = vld [vmem:[%s1778_s14 + $0x14] sm:$0xf0] }
  0x3a   : > { %1499 = vmatpush.bf16.msra.mxu1 %v1410_v4  ;;  %1500 = vmatpush.bf16.msra.mxu2 %v1410_v4  ;;  %v1375_v56 = vld [vmem:[%s1778_s14 + $0x4] sm:$0xf]  ;;  %v1108_v57 = vld [vmem:[%s1778_s14 + $0x10] sm:$0xf0]  ;;  %v1376_v60 = vld [vmem:[%s1778_s14 + $0xc] sm:$0xf]  ;;  %v1115_v63 = vor.u32 %v1378_v59, %v1114_v58 }
  0x3b   : > { %1501 = vmatpush.bf16.msra.mxu3 %v1410_v4  ;;  %674 = vmatpush.bf16.msra.mxu0 %v1410_v4  ;;  %v1116_v61 = vld [vmem:[%s1778_s14 + $0x18] sm:$0xf0]  ;;  %v1111_v62 = vor.u32 %v1375_v56, %v1108_v57  ;;  %v1379_v1 = vld [vmem:[%s1778_s14 + $0x24] sm:$0xf]  ;;  %v1124_v2 = vld [vmem:[%s1778_s14 + $0x30] sm:$0xf0] }
  0x3c   : > { %v1119_v0 = vor.u32 %v1376_v60, %v1116_v61  ;;  %v1130_v3 = vld [vmem:[%s1778_s14 + $0x28] sm:$0xf]  ;;  %v1382_v4 = vld [vmem:[%s1778_s14 + $0x34] sm:$0xf0]  ;;  %v1383_v10 = vld [vmem:[%s1778_s14 + $0x44] sm:$0xf] }
  0x3d   : > { %v1131_v8 = vor.u32 %v1382_v4, %v1130_v3  ;;  %v1140_v11 = vld [vmem:[%s1778_s14 + $0x50] sm:$0xf0]  ;;  %v1146_v12 = vld [vmem:[%s1778_s14 + $0x48] sm:$0xf]  ;;  %v1386_v13 = vld [vmem:[%s1778_s14 + $0x54] sm:$0xf0] }
  0x3e   : > { %1502 = vmatpush.bf16.msra.mxu1 %v1409_v5  ;;  %1503 = vmatpush.bf16.msra.mxu2 %v1409_v5  ;;  %v1156_v20 = vld [vmem:[%s1778_s14 + $0x70] sm:$0xf0]  ;;  %v1162_v21 = vld [vmem:[%s1778_s14 + $0x68] sm:$0xf]  ;;  %v1392_v32 = vld [vmem:[%s1778_s14 + $0x8c] sm:$0xf] }
  0x3f   : > { %1504 = vmatpush.bf16.msra.mxu3 %v1409_v5  ;;  %675 = vmatpush.bf16.msra.mxu0 %v1409_v5  ;;  %v1380_v5 = vld [vmem:[%s1778_s14 + $0x2c] sm:$0xf]  ;;  %v1180_v33 = vld [vmem:[%s1778_s14 + $0x98] sm:$0xf0]  ;;  %v1395_v37 = vld [vmem:[%s1778_s14 + $0xa4] sm:$0xf] }
  0x40   : > { %v1183_v36 = vor.u32 %v1392_v32, %v1180_v33  ;;  %v1403_v61 = vld [vmem:[%s1778_s14 + $0xe4] sm:$0xf] }
  0x42   : > { %1505 = vmatpush.bf16.msra.mxu1 %v1408_v6  ;;  %1506 = vmatpush.bf16.msra.mxu2 %v1408_v6 }
  0x43   : > { %1507 = vmatpush.bf16.msra.mxu3 %v1408_v6  ;;  %676 = vmatpush.bf16.msra.mxu0 %v1408_v6  ;;  %v1132_v6 = vld [vmem:[%s1778_s14 + $0x38] sm:$0xf0] }
  0x44   : > { %v1135_v9 = vor.u32 %v1380_v5, %v1132_v6 }
  0x46   : > { %1508 = vmatpush.bf16.msra.mxu1 %v1407_v7  ;;  %1509 = vmatpush.bf16.msra.mxu2 %v1407_v7 }
  0x47   : > { %1510 = vmatpush.bf16.msra.mxu3 %v1407_v7  ;;  %677 = vmatpush.bf16.msra.mxu0 %v1407_v7  ;;  %v1127_v7 = vor.u32 %v1379_v1, %v1124_v2  ;;  %v1404_v1 = vld [vmem:[%s1778_s14 + $0xec] sm:$0xf]  ;;  %v1228_v2 = vld [vmem:[%s1778_s14 + $0xf8] sm:$0xf0] }
  0x49   : > { %688 = vmatmul.bf16.vlgmr.msra.gmra.mxu1 %v1139_v17  ;;  %698 = vmatmul.bf16.vlgmr.msra.gmra.mxu2 %v1171_v18  ;;  %v1147_v17 = vor.u32 %v1386_v13, %v1146_v12 }
  0x4a   : > { %768 = vmatpush.bf16.msrb.mxu2 %v1430_v14  ;;  %719 = vmatpush.bf16.msrb.mxu1 %v1422_v15  ;;  %v1384_v14 = vld [vmem:[%s1778_s14 + $0x4c] sm:$0xf]  ;;  %v1148_v15 = vld [vmem:[%s1778_s14 + $0x58] sm:$0xf0] }
  0x4b   : > { %817 = vmatpush.bf16.msrb.mxu3 %v1438_v16  ;;  %678 = vmatmul.bf16.vlgmr.msra.gmra.mxu0 %v1107_v25  ;;  %v1143_v16 = vor.u32 %v1383_v10, %v1140_v11  ;;  %v1151_v18 = vor.u32 %v1384_v14, %v1148_v15 }
  0x4c   : > { %708 = vmatmul.bf16.vlgmr.msra.gmra.mxu3 %v1203_v19  ;;  %v1387_v19 = vld [vmem:[%s1778_s14 + $0x64] sm:$0xf] }
  0x4d   : > { %v1159_v25 = vor.u32 %v1387_v19, %v1156_v20 }
  0x4e   : > { %769 = vmatpush.bf16.msrb.mxu2 %v1429_v22  ;;  %720 = vmatpush.bf16.msrb.mxu1 %v1421_v23  ;;  %v1390_v22 = vld [vmem:[%s1778_s14 + $0x74] sm:$0xf0]  ;;  %v1388_v23 = vld [vmem:[%s1778_s14 + $0x6c] sm:$0xf] }
  0x4f   : > { %818 = vmatpush.bf16.msrb.mxu3 %v1437_v24  ;;  %v1164_v24 = vld [vmem:[%s1778_s14 + $0x78] sm:$0xf0] }
  0x52   : > { %770 = vmatpush.bf16.msrb.mxu2 %v1428_v26  ;;  %721 = vmatpush.bf16.msrb.mxu1 %v1420_v27  ;;  %v1163_v26 = vor.u32 %v1390_v22, %v1162_v21  ;;  %v1167_v27 = vor.u32 %v1388_v23, %v1164_v24 }
  0x53   : > { %819 = vmatpush.bf16.msrb.mxu3 %v1436_v28  ;;  %v1391_v28 = vld [vmem:[%s1778_s14 + $0x84] sm:$0xf] }
  0x56   : > { %771 = vmatpush.bf16.msrb.mxu2 %v1427_v29  ;;  %722 = vmatpush.bf16.msrb.mxu1 %v1419_v30  ;;  %v1172_v29 = vld [vmem:[%s1778_s14 + $0x90] sm:$0xf0]  ;;  %v1178_v30 = vld [vmem:[%s1778_s14 + $0x88] sm:$0xf] }
  0x57   : > { %820 = vmatpush.bf16.msrb.mxu3 %v1435_v31  ;;  %v1394_v31 = vld [vmem:[%s1778_s14 + $0x94] sm:$0xf0]  ;;  %v1175_v34 = vor.u32 %v1391_v28, %v1172_v29 }
  0x58   : > { %v1179_v35 = vor.u32 %v1394_v31, %v1178_v30 }
  0x59   : > { %693 = vmatmul.bf16.gmra.mxu1 %v1155_v41  ;;  %703 = vmatmul.bf16.gmra.mxu2 %v1187_v42  ;;  %v1396_v41 = vld [vmem:[%s1778_s14 + $0xac] sm:$0xf]  ;;  %v1196_v42 = vld [vmem:[%s1778_s14 + $0xb8] sm:$0xf0] }
  0x5a   : > { %772 = vmatpush.bf16.msrb.mxu2 %v1426_v38  ;;  %723 = vmatpush.bf16.msrb.mxu1 %v1418_v39  ;;  %v1188_v38 = vld [vmem:[%s1778_s14 + $0xb0] sm:$0xf0]  ;;  %v1194_v39 = vld [vmem:[%s1778_s14 + $0xa8] sm:$0xf]  ;;  %v1199_v45 = vor.u32 %v1396_v41, %v1196_v42 }
  0x5b   : > { %821 = vmatpush.bf16.msrb.mxu3 %v1434_v40  ;;  %683 = vmatmul.bf16.gmra.mxu0 %v1123_v49  ;;  %v1398_v40 = vld [vmem:[%s1778_s14 + $0xb4] sm:$0xf0]  ;;  %v1204_v49 = vld [vmem:[%s1778_s14 + $0xd0] sm:$0xf0] }
  0x5c   : > { %713 = vmatmul.bf16.gmra.mxu3 %v1219_v43  ;;  %v1191_v43 = vor.u32 %v1395_v37, %v1188_v38  ;;  %v1195_v44 = vor.u32 %v1398_v40, %v1194_v39 }
  0x5e   : > { %773 = vmatpush.bf16.msrb.mxu2 %v1425_v46  ;;  %724 = vmatpush.bf16.msrb.mxu1 %v1417_v47  ;;  %v874_v46 = vld [vmem:[%s2049_s2] sm:$0xf] }
  0x5f   : > { %822 = vmatpush.bf16.msrb.mxu3 %v1433_v48  ;;  %v906_v47 = vsel %vm904_vm0, %v874_v46, 0  ;;  %v1399_v48 = vld [vmem:[%s1778_s14 + $0xc4] sm:$0xf] }
  0x60   : > { %915 = vmatpush.bf16.msrb.mxu0 %v906_v47 }
  0x62   : > { %774 = vmatpush.bf16.msrb.mxu2 %v1424_v50  ;;  %725 = vmatpush.bf16.msrb.mxu1 %v1416_v51  ;;  %v1210_v50 = vld [vmem:[%s1778_s14 + $0xc8] sm:$0xf]  ;;  %v1402_v51 = vld [vmem:[%s1778_s14 + $0xd4] sm:$0xf0] }
  0x63   : > { %823 = vmatpush.bf16.msrb.mxu3 %v1432_v52  ;;  %v1400_v52 = vld [vmem:[%s1778_s14 + $0xcc] sm:$0xf] }
  0x66   : > { %775 = vmatpush.bf16.msrb.mxu2 %v1423_v53  ;;  %726 = vmatpush.bf16.msrb.mxu1 %v1415_v54  ;;  %v1212_v53 = vld [vmem:[%s1778_s14 + $0xd8] sm:$0xf0]  ;;  %v1207_v54 = vor.u32 %v1399_v48, %v1204_v49 }
  0x67   : > { %824 = vmatpush.bf16.msrb.mxu3 %v1431_v55  ;;  %v1211_v55 = vor.u32 %v1402_v51, %v1210_v50  ;;  %v1215_v57 = vor.u32 %v1400_v52, %v1212_v53 }
  0x69   : > { %727 = vmatmul.bf16.vlgmr.msrb.gmra.mxu1 %v1111_v62  ;;  %776 = vmatmul.bf16.vlgmr.msrb.gmra.mxu2 %v1115_v63  ;;  %v1220_v62 = vld [vmem:[%s1778_s14 + $0xf0] sm:$0xf0]  ;;  %v1226_v63 = vld [vmem:[%s1778_s14 + $0xe8] sm:$0xf] }
  0x6a   : > { %v1223_v5 = vor.u32 %v1403_v61, %v1220_v62 }
  0x6c   : > { %825 = vmatmul.bf16.vlgmr.msrb.gmra.mxu3 %v1119_v0  ;;  %v1406_v0 = vld [vmem:[%s1778_s14 + $0xf4] sm:$0xf0] }
  0x6d   : > { %v1227_v6 = vor.u32 %v1406_v0, %v1226_v63 }
  0x79   : > { %732 = vmatmul.bf16.gmra.mxu1 %v1127_v7  ;;  %781 = vmatmul.bf16.gmra.mxu2 %v1131_v8  ;;  %v1231_v8 = vor.u32 %v1404_v1, %v1228_v2 }
  0x7c   : > { %830 = vmatmul.bf16.gmra.mxu3 %v1135_v9 }
  0x89   : > { %737 = vmatmul.bf16.gmra.mxu1 %v1143_v16  ;;  %786 = vmatmul.bf16.gmra.mxu2 %v1147_v17 }
  0x8c   : > { %835 = vmatmul.bf16.gmra.mxu3 %v1151_v18 }
  0x99   : > { %742 = vmatmul.bf16.gmra.mxu1 %v1159_v25  ;;  %791 = vmatmul.bf16.gmra.mxu2 %v1163_v26 }
  0x9c   : > { %840 = vmatmul.bf16.gmra.mxu3 %v1167_v27 }
  0xa9   : > { %747 = vmatmul.bf16.gmra.mxu1 %v1175_v34  ;;  %796 = vmatmul.bf16.gmra.mxu2 %v1179_v35 }
  0xac   : > { %845 = vmatmul.bf16.gmra.mxu3 %v1183_v36 }
  0xb9   : > { %752 = vmatmul.bf16.gmra.mxu1 %v1191_v43  ;;  %801 = vmatmul.bf16.gmra.mxu2 %v1195_v44 }
  0xbc   : > { %850 = vmatmul.bf16.gmra.mxu3 %v1199_v45 }
  0xc6   : > { %v1941_v56 = vpop.f32.mrf.mxu1 }
  0xc8   : > { %v679_v12 = vpop.f32.mrf.mxu0 }
  0xc9   : > { %757 = vmatmul.bf16.gmra.mxu1 %v1207_v54  ;;  %806 = vmatmul.bf16.gmra.mxu2 %v1211_v55 }
  0xcc   : > { %855 = vmatmul.bf16.gmra.mxu3 %v1215_v57  ;;  %v1943_v58 = vpop.f32.mrf.mxu2 }
  0xce   : > { %v691_v60 = vpop.f32.mrf.mxu1 }
  0xcf   : > { %v1945_v59 = vpop.f32.mrf.mxu3 }
  0xd0   : > { %v681_v18 = vpop.f32.mrf.mxu0 }
  0xd4   : > { %v1953_v3 = vpop.f32.mrf.mxu2 }
  0xd6   : > { %v694_v7 = vpop.f32.mrf.mxu1 }
  0xd7   : > { %v1955_v4 = vpop.f32.mrf.mxu3 }
  0xd8   : > { %v684_v29 = vpop.f32.mrf.mxu0 }
  0xd9   : > { %762 = vmatmul.bf16.gmra.mxu1 %v1223_v5  ;;  %811 = vmatmul.bf16.gmra.mxu2 %v1227_v6 }
  0xdc   : > { %860 = vmatmul.bf16.gmra.mxu3 %v1231_v8  ;;  %v1957_v9 = vpop.f32.mrf.mxu2 }
  0xde   : > { %v696_v11 = vpop.f32.mrf.mxu1 }
  0xdf   : > { %v1959_v10 = vpop.f32.mrf.mxu3 }
  0xe0   : > { %v686_v35 = vpop.f32.mrf.mxu0 }
  0xe4   : > { %v1961_v13 = vpop.f32.mrf.mxu2 }
  0xe6   : > { %v728_v15 = vpop.f32.mrf.mxu1 }
  0xe7   : > { %v1963_v14 = vpop.f32.mrf.mxu3  ;;  %v729_v20 = vadd.f32 %v728_v15, %v679_v12 }
  0xec   : > { %v777_v16 = vpop.f32.mrf.mxu2 }
  0xed   : > { %v778_v21 = vadd.f32 %v777_v16, %v729_v20 }
  0xee   : > { %v730_v19 = vpop.f32.mrf.mxu1 }
  0xef   : > { %v826_v17 = vpop.f32.mrf.mxu3  ;;  %v731_v22 = vadd.f32 %v730_v19, %v681_v18 }
  0xf0   : > { %v827_v27 = vadd.f32 %v826_v17, %v778_v21 }
  0xf4   : > { %v779_v23 = vpop.f32.mrf.mxu2 }
  0xf5   : > { %v780_v24 = vadd.f32 %v779_v23, %v731_v22 }
  0xf6   : > { %v733_v26 = vpop.f32.mrf.mxu1 }
  0xf7   : > { %v828_v25 = vpop.f32.mrf.mxu3  ;;  %v734_v34 = vadd.f32 %v733_v26, %v684_v29 }
  0xf8   : > { %v829_v28 = vadd.f32 %v828_v25, %v780_v24 }
  0xfa   : > { %v866_v30 = vpack.c.bf16 %v829_v28, %v827_v27 }
  0xfc   : > { %1360 = vmatmul.msk.bf16.vlgmr.msrb.gmra.mxu0 %vm879_vm1, %v866_v30  ;;  %v782_v31 = vpop.f32.mrf.mxu2 }
  0xfd   : > { %v783_v36 = vadd.f32 %v782_v31, %v734_v34 }
  0xfe   : > { %v735_v33 = vpop.f32.mrf.mxu1 }
  0xff   : > { %v831_v32 = vpop.f32.mrf.mxu3  ;;  %v736_v37 = vadd.f32 %v735_v33, %v686_v35 }
 0x100   : > { %v832_v42 = vadd.f32 %v831_v32, %v783_v36 }
 0x104   : > { %v784_v38 = vpop.f32.mrf.mxu2 }
 0x105   : > { %v785_v39 = vadd.f32 %v784_v38, %v736_v37 }
 0x106   : > { %v738_v41 = vpop.f32.mrf.mxu1 }
 0x107   : > { %v833_v40 = vpop.f32.mrf.mxu3  ;;  %v739_v48 = vadd.f32 %v738_v41, %v1941_v56 }
 0x108   : > { %v834_v43 = vadd.f32 %v833_v40, %v785_v39 }
 0x10a   : > { %v867_v44 = vpack.c.bf16 %v834_v43, %v832_v42 }
 0x10c   : > { %1361 = vmatmul.msk.bf16.gmra.mxu0 %vm879_vm1, %v867_v44  ;;  %v787_v45 = vpop.f32.mrf.mxu2 }
 0x10d   : > { %v788_v49 = vadd.f32 %v787_v45, %v739_v48 }
 0x10e   : > { %v740_v47 = vpop.f32.mrf.mxu1 }
 0x10f   : > { %v836_v46 = vpop.f32.mrf.mxu3  ;;  %v741_v50 = vadd.f32 %v740_v47, %v691_v60 }
 0x110   : > { %v837_v55 = vadd.f32 %v836_v46, %v788_v49 }
 0x114   : > { %v789_v51 = vpop.f32.mrf.mxu2 }
 0x115   : > { %v790_v52 = vadd.f32 %v789_v51, %v741_v50 }
 0x116   : > { %v743_v54 = vpop.f32.mrf.mxu1 }
 0x117   : > { %v838_v53 = vpop.f32.mrf.mxu3  ;;  %v744_v1 = vadd.f32 %v743_v54, %v694_v7 }
 0x118   : > { %v839_v57 = vadd.f32 %v838_v53, %v790_v52 }
 0x11a   : > { %v868_v61 = vpack.c.bf16 %v839_v57, %v837_v55 }
 0x11c   : > { %1362 = vmatmul.msk.bf16.gmra.mxu0 %vm879_vm1, %v868_v61  ;;  %v792_v62 = vpop.f32.mrf.mxu2 }
 0x11d   : > { %v793_v2 = vadd.f32 %v792_v62, %v744_v1  ;;  %v1985_v1 = vld [vmem:[%s2050_s3] ss:$0 sm:$0xff] }
 0x11e   : > { %v745_v0 = vpop.f32.mrf.mxu1 }
 0x11f   : > { %v841_v63 = vpop.f32.mrf.mxu3  ;;  %v746_v5 = vadd.f32 %v745_v0, %v696_v11 }
 0x120   : > { %v842_v60 = vadd.f32 %v841_v63, %v793_v2 }
 0x124   : > { %v794_v6 = vpop.f32.mrf.mxu2 }
 0x125   : > { %v795_v8 = vadd.f32 %v794_v6, %v746_v5 }
 0x126   : > { %v748_v12 = vpop.f32.mrf.mxu1 }
 0x127   : > { %v843_v56 = vpop.f32.mrf.mxu3  ;;  %v749_v20 = vadd.f32 %v748_v12, %v1943_v58 }
 0x128   : > { %v844_v15 = vadd.f32 %v843_v56, %v795_v8 }
 0x12a   : > { %v869_v16 = vpack.c.bf16 %v844_v15, %v842_v60 }
 0x12c   : > { %1363 = vmatmul.msk.bf16.gmra.mxu0 %vm879_vm1, %v869_v16  ;;  %v797_v17 = vpop.f32.mrf.mxu2 }
 0x12d   : > { %v798_v21 = vadd.f32 %v797_v17, %v749_v20 }
 0x12e   : > { %v750_v19 = vpop.f32.mrf.mxu1 }
 0x12f   : > { %v846_v18 = vpop.f32.mrf.mxu3  ;;  %v751_v22 = vadd.f32 %v750_v19, %v1953_v3 }
 0x130   : > { %v847_v25 = vadd.f32 %v846_v18, %v798_v21 }
 0x134   : > { %v799_v7 = vpop.f32.mrf.mxu2 }
 0x135   : > { %v800_v23 = vadd.f32 %v799_v7, %v751_v22 }
 0x136   : > { %v753_v24 = vpop.f32.mrf.mxu1 }
 0x137   : > { %v848_v11 = vpop.f32.mrf.mxu3  ;;  %v754_v31 = vadd.f32 %v753_v24, %v1957_v9 }
 0x138   : > { %v849_v26 = vadd.f32 %v848_v11, %v800_v23 }
 0x13a   : > { %v870_v27 = vpack.c.bf16 %v849_v26, %v847_v25 }
 0x13c   : > { %1364 = vmatmul.msk.bf16.gmra.mxu0 %vm879_vm1, %v870_v27  ;;  %v802_v28 = vpop.f32.mrf.mxu2 }
 0x13d   : > { %v803_v32 = vadd.f32 %v802_v28, %v754_v31 }
 0x13e   : > { %v755_v30 = vpop.f32.mrf.mxu1 }
 0x13f   : > { %v851_v29 = vpop.f32.mrf.mxu3  ;;  %v756_v58 = vadd.f32 %v755_v30, %v1961_v13 }
 0x140   : > { %v852_v36 = vadd.f32 %v851_v29, %v803_v32 }
 0x144   : > { %v804_v33 = vpop.f32.mrf.mxu2 }
 0x145   : > { %v805_v34 = vadd.f32 %v804_v33, %v756_v58 }
 0x146   : > { %v758_v35 = vpop.f32.mrf.mxu1 }
 0x147   : > { %v853_v3 = vpop.f32.mrf.mxu3  ;;  %v759_v42 = vadd.f32 %v758_v35, %v1945_v59 }
 0x148   : > { %v854_v37 = vadd.f32 %v853_v3, %v805_v34 }
 0x14a   : > { %v871_v38 = vpack.c.bf16 %v854_v37, %v852_v36 }
 0x14c   : > { %1365 = vmatmul.msk.bf16.gmra.mxu0 %vm879_vm1, %v871_v38  ;;  %v807_v39 = vpop.f32.mrf.mxu2 }
 0x14d   : > { %v808_v43 = vadd.f32 %v807_v39, %v759_v42 }
 0x14e   : > { %v760_v41 = vpop.f32.mrf.mxu1 }
 0x14f   : > { %v856_v40 = vpop.f32.mrf.mxu3  ;;  %v761_v9 = vadd.f32 %v760_v41, %v1955_v4 }
 0x150   : > { %v857_v47 = vadd.f32 %v856_v40, %v808_v43 }
 0x154   : > { %v809_v44 = vpop.f32.mrf.mxu2 }
 0x155   : > { %v810_v45 = vadd.f32 %v809_v44, %v761_v9 }
 0x156   : > { %v763_v46 = vpop.f32.mrf.mxu1 }
 0x157   : > { %v858_v13 = vpop.f32.mrf.mxu3  ;;  %v764_v53 = vadd.f32 %v763_v46, %v1959_v10 }
 0x158   : > { %v859_v48 = vadd.f32 %v858_v13, %v810_v45 }
 0x15a   : > { %v872_v49 = vpack.c.bf16 %v859_v48, %v857_v47 }
 0x15c   : > { %1366 = vmatmul.msk.bf16.gmra.mxu0 %vm879_vm1, %v872_v49  ;;  %v812_v50 = vpop.f32.mrf.mxu2 }
 0x15d   : > { %v813_v54 = vadd.f32 %v812_v50, %v764_v53 }
 0x15e   : > { %v765_v52 = vpop.f32.mrf.mxu1 }
 0x15f   : > { %v861_v51 = vpop.f32.mrf.mxu3  ;;  %v766_v59 = vadd.f32 %v765_v52, %v1963_v14 }
 0x160   : > { %v862_v61 = vadd.f32 %v861_v51, %v813_v54 }
 0x164   : > { %v814_v55 = vpop.f32.mrf.mxu2 }
 0x165   : > { %v815_v4 = vadd.f32 %v814_v55, %v766_v59 }
 0x167   : > { %v863_v57 = vpop.f32.mrf.mxu3 }
 0x168   : > { %v864_v62 = vadd.f32 %v863_v57, %v815_v4 }
 0x16a   : > { %v873_v63 = vpack.c.bf16 %v864_v62, %v862_v61 }
 0x16c   : > { %1367 = vmatmul.msk.bf16.gmra.mxu0 %vm879_vm1, %v873_v63 }
 0x179   : > { %v917_v0 = vpop.f32.mrf.mxu0 }
 0x17a   : > { %v918_v2 = vadd.f32 %v1985_v1, %v917_v0 }
 0x17c   : > { %v957_v5 = vmax.f32 %v918_v2, 0.0 }
 0x181   : > { %v919_v10 = vpop.f32.mrf.mxu0 }
 0x182   : > { %v920_v14 = vadd.f32 %v1985_v1, %v919_v10 }
 0x184   : > { %v958_v6 = vmax.f32 %v920_v14, 0.0 }
 0x186   : > { %v1443_v8 = vpack.c.bf16 %v958_v6, %v957_v5 }
 0x188   : > { %1444 = vst [vmem:[%s1990_s25] sm:$0xff] %v1443_v8  }
 0x189   : > { %v922_v56 = vpop.f32.mrf.mxu0 }
 0x18a   : > { %v923_v12 = vadd.f32 %v1985_v1, %v922_v56 }
 0x18c   : > { %v959_v16 = vmax.f32 %v923_v12, 0.0 }
 0x191   : > { %v924_v60 = vpop.f32.mrf.mxu0 }
 0x192   : > { %v925_v15 = vadd.f32 %v1985_v1, %v924_v60 }
 0x194   : > { %v960_v17 = vmax.f32 %v925_v15, 0.0 }
 0x196   : > { %v1448_v18 = vpack.c.bf16 %v960_v17, %v959_v16 }
 0x198   : > { %1480 = vst [vmem:[%s1990_s25 + $0x8] sm:$0xff] %v1448_v18  }
 0x199   : > { %v927_v19 = vpop.f32.mrf.mxu0 }
 0x19a   : > { %v928_v20 = vadd.f32 %v1985_v1, %v927_v19 }
 0x19c   : > { %v961_v7 = vmax.f32 %v928_v20, 0.0 }
 0x1a1   : > { %v929_v21 = vpop.f32.mrf.mxu0 }
 0x1a2   : > { %v930_v22 = vadd.f32 %v1985_v1, %v929_v21 }
 0x1a4   : > { %v962_v23 = vmax.f32 %v930_v22, 0.0 }
 0x1a6   : > { %v1453_v11 = vpack.c.bf16 %v962_v23, %v961_v7 }
 0x1a8   : > { %1481 = vst [vmem:[%s1990_s25 + $0x10] sm:$0xff] %v1453_v11  }
 0x1a9   : > { %v932_v24 = vpop.f32.mrf.mxu0 }
 0x1aa   : > { %v933_v25 = vadd.f32 %v1985_v1, %v932_v24 }
 0x1ac   : > { %v963_v28 = vmax.f32 %v933_v25, 0.0 }
 0x1b1   : > { %v934_v26 = vpop.f32.mrf.mxu0 }
 0x1b2   : > { %v935_v27 = vadd.f32 %v1985_v1, %v934_v26 }
 0x1b4   : > { %v964_v29 = vmax.f32 %v935_v27, 0.0 }
 0x1b6   : > { %v1458_v30 = vpack.c.bf16 %v964_v29, %v963_v28 }
 0x1b8   : > { %1482 = vst [vmem:[%s1990_s25 + $0x18] sm:$0xff] %v1458_v30  }
 0x1b9   : > { %v937_v31 = vpop.f32.mrf.mxu0 }
 0x1ba   : > { %v938_v32 = vadd.f32 %v1985_v1, %v937_v31 }
 0x1bc   : > { %v965_v34 = vmax.f32 %v938_v32, 0.0 }
 0x1c1   : > { %v939_v58 = vpop.f32.mrf.mxu0 }
 0x1c2   : > { %v940_v33 = vadd.f32 %v1985_v1, %v939_v58 }
 0x1c4   : > { %v966_v3 = vmax.f32 %v940_v33, 0.0 }
 0x1c6   : > { %v1463_v35 = vpack.c.bf16 %v966_v3, %v965_v34 }
 0x1c8   : > { %1483 = vst [vmem:[%s1990_s25 + $0x20] sm:$0xff] %v1463_v35  }
 0x1c9   : > { %v942_v36 = vpop.f32.mrf.mxu0 }
 0x1ca   : > { %v943_v37 = vadd.f32 %v1985_v1, %v942_v36 }
 0x1cc   : > { %v967_v40 = vmax.f32 %v943_v37, 0.0 }
 0x1d1   : > { %v944_v38 = vpop.f32.mrf.mxu0 }
 0x1d2   : > { %v945_v39 = vadd.f32 %v1985_v1, %v944_v38 }
 0x1d4   : > { %v968_v41 = vmax.f32 %v945_v39, 0.0 }
 0x1d6   : > { %v1468_v42 = vpack.c.bf16 %v968_v41, %v967_v40 }
 0x1d8   : > { %1484 = vst [vmem:[%s1990_s25 + $0x28] sm:$0xff] %v1468_v42  }
 0x1d9   : > { %v947_v43 = vpop.f32.mrf.mxu0 }
 0x1da   : > { %v948_v9 = vadd.f32 %v1985_v1, %v947_v43 }
 0x1dc   : > { %v969_v13 = vmax.f32 %v948_v9, 0.0 }
 0x1e1   : > { %v949_v44 = vpop.f32.mrf.mxu0 }
 0x1e2   : > { %v950_v45 = vadd.f32 %v1985_v1, %v949_v44 }
 0x1e4   : > { %v970_v46 = vmax.f32 %v950_v45, 0.0 }
 0x1e6   : > { %v1473_v47 = vpack.c.bf16 %v970_v46, %v969_v13 }
 0x1e8   : > { %1485 = vst [vmem:[%s1990_s25 + $0x30] sm:$0xff] %v1473_v47  }
 0x1e9   : > { %v952_v48 = vpop.f32.mrf.mxu0 }
 0x1ea   : > { %v953_v49 = vadd.f32 %v1985_v1, %v952_v48 }
 0x1ec   : > { %v971_v52 = vmax.f32 %v953_v49, 0.0 }
 0x1f1   : > { %v954_v50 = vpop.f32.mrf.mxu0 }
 0x1f2   : > { %v955_v51 = vadd.f32 %v1985_v1, %v954_v50 }
 0x1f4   : > { %v972_v53 = vmax.f32 %v955_v51, 0.0 }
 0x1f6   : > { %v1478_v54 = vpack.c.bf16 %v972_v53, %v971_v52 }
 0x1f8   : > { %1486 = vst [vmem:[%s1990_s25 + $0x38] sm:$0xff] %v1478_v54  }
 0x1f9   : > { %1619 = shalt.err (!%p1616_p4)
}
 0x1fa   : > { %s1662_s7 = smov 64   ;;  %s1663_s26 = smov 4  }
 0x1fb   : > { %1513 = dma.vmem_to_hbm [thread:$0]  (%p1738_p10), %s1019_s8, 1024, %s1021_s10, %s1006_s9, %s1662_s7, %s1662_s7, %s1663_s26  }
 0x1fc PF: > { %p1524_p5 = scmp.ge.s32.totalorder %s1658_s18, 2  ;;  %s1035_s23 = sand.u32 1, %s1646_s15  }
 0x1fd   : > { %s1036_s25 = scalar_lea.sflag [#allocation4], %s1035_s23 }
 0x1fe   : > { %p1520_p7 = pnand %p1524_p5, %p1742_p11 }
 0x200   : > { %p1521_p8 = pneg %p1520_p7 }
 0x202   : > { %1641 = dma.done.wait (%p1521_p8), %s1036_s25, 1024  }
 0x203   : > { %1643 = vsyncadd (%p1521_p8), %s1036_s25, 4294966272  ;;  %p17_p9 = scmp.ge.s32.totalorder %s1714_s21, 6   ;;  %s2057_s15 = smov %s1650_s16 }
 0x204   : > { %s2058_s16 = smov %s1654_s17  ;;  %s2059_s17 = smov %s1726_s24 }
 0x205   : > { %s2060_s18 = smov %s1714_s21  ;;  %19 = sbr.rel (!%p17_p9) target bundleno = 5 (0x5), region = 81 }
 0x20a   :  { %1042 = vsyncpa [#allocation3], 1 }
 0x20b   :  { %1044 = vsyncpa [#allocation3 + $0x1], 1 }
 0x20c   :  { %1045 = vsyncpa [#allocation4], 1 }
 0x20d   :  { %1047 = vsyncpa [#allocation4 + $0x1], 1 }

</bundles_post_ra>
